<compile_context>
chip_gen: v7x
topology: tpu7x:2x2x1
jax: 0.10.0
libtpu: 0.0.40
codegen_flags: <defaults>
</compile_context>

<pallas_src>
import functools

import jax
import jax.numpy as jnp
from jax.experimental import pallas as pl
from jax.experimental.pallas import tpu as pltpu

block_size = 64
n_embd = 84
num_heads = 4
head_size = n_embd // num_heads  # 21


def _round_up(x, m):
    return (x + m - 1) // m * m


def _mha_kernel(x_ref, wqkv_ref, wproj_ref, bproj_ref, o_ref, *,
                scale, n_heads, hs_pad):
    # x_ref:     (Bb, Tp, Cp)
    # wqkv_ref:  (Cp, 3*H*hs_pad)   columns = [Q heads | K heads | V heads]
    # wproj_ref: (H, hs_pad, Cp)    per-head slice of the output projection
    # bproj_ref: (1, Cp)
    # o_ref:     (Bb, Tp, Cp)       lane-dense output block
    Bb, Tp, Cp = x_ref.shape
    Hhs = n_heads * hs_pad

    x2 = x_ref[...].reshape(Bb * Tp, Cp)

    # One fused QKV projection for all heads (single big MXU launch).
    qkv = jnp.dot(x2, wqkv_ref[...], preferred_element_type=jnp.float32)

    # Causal mask, shared across heads / batch rows.
    row = jax.lax.broadcasted_iota(jnp.int32, (Tp, Tp), 0)
    col = jax.lax.broadcasted_iota(jnp.int32, (Tp, Tp), 1)
    causal = (row >= col)[None]          # (1, Tp, Tp)
    neg_big = jnp.float32(-1e30)         # large finite: no NaN rows if T is padded

    y = jnp.zeros((Bb * Tp, Cp), dtype=jnp.float32)
    for h in range(n_heads):             # H is small & static -> unrolled
        q = qkv[:, h * hs_pad:(h + 1) * hs_pad].reshape(Bb, Tp, hs_pad)
        k = qkv[:, Hhs + h * hs_pad:Hhs + (h + 1) * hs_pad].reshape(Bb, Tp, hs_pad)
        v = qkv[:, 2 * Hhs + h * hs_pad:2 * Hhs + (h + 1) * hs_pad].reshape(Bb, Tp, hs_pad)

        s = jnp.einsum('btd,bsd->bts', q, k,
                       preferred_element_type=jnp.float32) * scale
        s = jnp.where(causal, s, neg_big)

        # numerically-stable softmax (kept in f32)
        s = s - jnp.max(s, axis=-1, keepdims=True)
        p = jnp.exp(s)
        p = p * pl.reciprocal(jnp.sum(p, axis=-1, keepdims=True), approx=True)

        oh = jnp.einsum('bts,bsd->btd', p, v,
                        preferred_element_type=jnp.float32)      # (Bb, Tp, hs_pad)

        # Output projection as per-head MXU accumulation: no concatenate.
        y = y + jnp.dot(oh.reshape(Bb * Tp, hs_pad), wproj_ref[h],
                        preferred_element_type=jnp.float32)

    y = y + bproj_ref[...]
    o_ref[...] = y.reshape(Bb, Tp, Cp).astype(o_ref.dtype)


def _pick_batch_block(B, Tp):
    """~128 rows per grid step when possible, but keep >=2 grid steps (v7x)."""
    bb = max(1, min(B, max(1, 128 // Tp)))
    if B >= 2:
        bb = min(bb, max(1, B // 2))
    while B % bb:
        bb -= 1
    return bb


def multi_head_attention(x, wq, wk, wv, wp, bp, *,
                         compute_dtype=jnp.float32, batch_block=None):
    """x: (B,T,C); wq/wk/wv: (H,C,hs) input-major; wp: (C,C) input-major; bp: (1,C)."""
    B, T, C = x.shape
    H, _, hs = wq.shape
    scale = float(C) ** -0.5            # PyTorch Head scales by n_embd**-0.5

    Cp = _round_up(C, 128)              # lane-dense last dim
    hsp = _round_up(hs, 32)
    Tp = _round_up(T, 8)

    # Zero-pad activations/weights (exact: padded rows/cols contribute 0).
    x_p = jnp.pad(x, ((0, 0), (0, Tp - T), (0, Cp - C))).astype(compute_dtype)

    def _pad_head_w(w):                 # (H, C, hs) -> (Cp, H*hsp), head-major cols
        w = jnp.pad(w, ((0, 0), (0, Cp - C), (0, hsp - hs)))
        return jnp.transpose(w, (1, 0, 2)).reshape(Cp, H * hsp)

    wqkv = jnp.concatenate([_pad_head_w(wq), _pad_head_w(wk), _pad_head_w(wv)],
                           axis=1).astype(compute_dtype)            # (Cp, 3*H*hsp)
    wproj = jnp.pad(wp.reshape(H, hs, C),
                    ((0, 0), (0, hsp - hs), (0, Cp - C))).astype(compute_dtype)
    bproj = jnp.pad(bp, ((0, 0), (0, Cp - C))).astype(jnp.float32)  # (1, Cp)

    bb = batch_block if batch_block is not None else _pick_batch_block(B, Tp)
    grid = (B // bb,)

    kernel = functools.partial(_mha_kernel, scale=scale, n_heads=H, hs_pad=hsp)

    out_p = pl.pallas_call(
        kernel,
        out_shape=jax.ShapeDtypeStruct((B, Tp, Cp), jnp.float32),
        grid_spec=pltpu.PrefetchScalarGridSpec(
            num_scalar_prefetch=0,
            grid=grid,
            in_specs=[
                pl.BlockSpec((bb, Tp, Cp), lambda b: (b, 0, 0)),
                pl.BlockSpec((Cp, 3 * H * hsp), lambda b: (0, 0)),
                pl.BlockSpec((H, hsp, Cp), lambda b: (0, 0, 0)),
                pl.BlockSpec((1, Cp), lambda b: (0, 0)),
            ],
            out_specs=pl.BlockSpec((bb, Tp, Cp), lambda b: (b, 0, 0)),
        ),
        compiler_params=pltpu.CompilerParams(
            dimension_semantics=("parallel",),
        ),
    )(x_p, wqkv, wproj, bproj)

    return out_p[:, :T, :C]


def _reference(x, wq, wk, wv, wp, bp):
    B, T, C = x.shape
    scale = C ** -0.5
    mask = jnp.tril(jnp.ones((T, T), dtype=bool))
    outs = []
    for h in range(wq.shape[0]):
        q = x @ wq[h]
        k = x @ wk[h]
        v = x @ wv[h]
        s = (q @ jnp.swapaxes(k, -2, -1)) * scale
        s = jnp.where(mask, s, -jnp.inf)
        p = jax.nn.softmax(s, axis=-1)
        outs.append(p @ v)
    cat = jnp.concatenate(outs, axis=-1)
    return cat @ wp + bp


if __name__ == "__main__":
    key = jax.random.PRNGKey(0)
    B, T = 2, 8  # T <= block_size (64)

    kx, kq, kk, kv, kp, kb = jax.random.split(key, 6)
    x = jax.random.normal(kx, (B, T, n_embd), dtype=jnp.float32)

    # Deterministic parameter init (shapes follow nn.Linear(n_embd, head_size,
    # bias=False) per head, and nn.Linear(n_embd, n_embd) for the projection).
    wq = jax.random.normal(kq, (num_heads, n_embd, head_size), dtype=jnp.float32) * 0.05
    wk = jax.random.normal(kk, (num_heads, n_embd, head_size), dtype=jnp.float32) * 0.05
    wv = jax.random.normal(kv, (num_heads, n_embd, head_size), dtype=jnp.float32) * 0.05
    wp = jax.random.normal(kp, (n_embd, n_embd), dtype=jnp.float32) * 0.05
    bp = jax.random.normal(kb, (1, n_embd), dtype=jnp.float32) * 0.05

    out = multi_head_attention(x, wq, wk, wv, wp, bp)
    out = jax.block_until_ready(out)

    ref = _reference(x, wq, wk, wv, wp, bp)
    assert out.shape == (B, T, n_embd)
    # tolerance accounts for the approx (EUP) reciprocal in the softmax denom
    assert jnp.allclose(out, ref, atol=2e-3, rtol=2e-3), "mismatch vs reference"

    print("KERNEL_OK")
</pallas_src>

<mosaic_0001>
module attributes {stable_mosaic.version = 11 : i64} {
  func.func @_mha_kernel(%arg0: i32, %arg1: memref<1x8x128xf32, #tpu.memory_space<vmem>>, %arg2: memref<128x384xf32, #tpu.memory_space<vmem>>, %arg3: memref<4x32x128xf32, #tpu.memory_space<vmem>>, %arg4: memref<1x128xf32, #tpu.memory_space<vmem>>, %arg5: memref<1x8x128xf32, #tpu.memory_space<vmem>>) attributes {dimension_semantics = [#tpu.dimension_semantics<parallel>], iteration_bounds = array<i64: 2>, scalar_prefetch = 0 : i64, scratch_operands = 0 : i64, tpu.core_type = #tpu.core_type<tc>, window_params = [{transform_indices = @transform_0, window_bounds = array<i64: 1, 8, 128>}, {pipeline_mode = #tpu.pipeline_mode<synchronous>, transform_indices = @transform_1, window_bounds = array<i64: 128, 384>}, {pipeline_mode = #tpu.pipeline_mode<synchronous>, transform_indices = @transform_2, window_bounds = array<i64: 4, 32, 128>}, {pipeline_mode = #tpu.pipeline_mode<synchronous>, transform_indices = @transform_3, window_bounds = array<i64: 1, 128>}, {transform_indices = @transform_4, window_bounds = array<i64: 1, 8, 128>}]} {
    %c0 = arith.constant 0 : index
    %c0_0 = arith.constant 0 : index
    %c0_1 = arith.constant 0 : index
    %0 = vector.load %arg1[%c0, %c0_0, %c0_1] : memref<1x8x128xf32, #tpu.memory_space<vmem>>, vector<1x8x128xf32>
    %1 = vector.shape_cast %0 : vector<1x8x128xf32> to vector<8x128xf32>
    %c0_2 = arith.constant 0 : index
    %c0_3 = arith.constant 0 : index
    %2 = vector.load %arg2[%c0_2, %c0_3] : memref<128x384xf32, #tpu.memory_space<vmem>>, vector<128x384xf32>
    %cst = arith.constant dense<0.000000e+00> : vector<8x384xf32>
    %3 = tpu.matmul %1, %2, %cst {dimension_numbers = #tpu.dot_dimension_numbers<[1], [0], [0], [1], [0, 0, 1, 1], [], []>} : vector<8x128xf32>, vector<128x384xf32>, vector<8x384xf32> -> vector<8x384xf32>
    %4 = tpu.iota {dimensions = array<i32: 0>} : vector<8x8xi32>
    %5 = tpu.iota {dimensions = array<i32: 1>} : vector<8x8xi32>
    %6 = arith.cmpi sge, %4, %5 : vector<8x8xi32>
    %7 = vector.shape_cast %6 : vector<8x8xi1> to vector<1x8x8xi1>
    %cst_4 = arith.constant 0.000000e+00 : f32
    %8 = vector.broadcast %cst_4 : f32 to vector<8x128xf32>
    %9 = vector.extract_strided_slice %3 {offsets = [0, 0], sizes = [8, 32], strides = [1, 1]} : vector<8x384xf32> to vector<8x32xf32>
    %10 = vector.shape_cast %9 : vector<8x32xf32> to vector<1x8x32xf32>
    %11 = vector.extract_strided_slice %3 {offsets = [0, 128], sizes = [8, 32], strides = [1, 1]} : vector<8x384xf32> to vector<8x32xf32>
    %12 = vector.shape_cast %11 : vector<8x32xf32> to vector<1x8x32xf32>
    %13 = vector.extract_strided_slice %3 {offsets = [0, 256], sizes = [8, 32], strides = [1, 1]} : vector<8x384xf32> to vector<8x32xf32>
    %14 = vector.shape_cast %13 : vector<8x32xf32> to vector<1x8x32xf32>
    "tpu.trace_start"() <{level = 10 : i32, message = "btd,bsd->bts"}> : () -> ()
    %cst_5 = arith.constant dense<0.000000e+00> : vector<1x8x8xf32>
    %15 = tpu.matmul %10, %12, %cst_5 {dimension_numbers = #tpu.dot_dimension_numbers<[2], [2], [1], [1], [0, 0, 0, 1, 1, 1], [0], [0]>} : vector<1x8x32xf32>, vector<1x8x32xf32>, vector<1x8x8xf32> -> vector<1x8x8xf32>
    "tpu.trace_stop"() : () -> ()
    %cst_6 = arith.constant 0.109108947 : f32
    %16 = vector.broadcast %cst_6 : f32 to vector<1x8x8xf32>
    %17 = arith.mulf %15, %16 : vector<1x8x8xf32>
    %cst_7 = arith.constant -1.000000e+30 : f32
    %18 = vector.broadcast %cst_7 : f32 to vector<1x8x8xf32>
    %19 = arith.select %7, %17, %18 : vector<1x8x8xi1>, vector<1x8x8xf32>
    %cst_8 = arith.constant dense<0xFF800000> : vector<1x8xf32>
    %20 = vector.multi_reduction <maximumf>, %19, %cst_8 [2] : vector<1x8x8xf32> to vector<1x8xf32>
    %21 = vector.shape_cast %20 : vector<1x8xf32> to vector<1x8x1xf32>
    %22 = vector.broadcast %21 : vector<1x8x1xf32> to vector<1x8x8xf32>
    %23 = arith.subf %19, %22 : vector<1x8x8xf32>
    %24 = math.exp %23 : vector<1x8x8xf32>
    %cst_9 = arith.constant dense<0.000000e+00> : vector<1x8xf32>
    %25 = vector.multi_reduction <add>, %24, %cst_9 [2] : vector<1x8x8xf32> to vector<1x8xf32>
    %26 = vector.shape_cast %25 : vector<1x8xf32> to vector<1x8x1xf32>
    %27 = tpu.reciprocal %26 {approx = true} : vector<1x8x1xf32> -> vector<1x8x1xf32>
    %28 = vector.broadcast %27 : vector<1x8x1xf32> to vector<1x8x8xf32>
    %29 = arith.mulf %24, %28 : vector<1x8x8xf32>
    "tpu.trace_start"() <{level = 10 : i32, message = "bts,bsd->btd"}> : () -> ()
    %cst_10 = arith.constant dense<0.000000e+00> : vector<1x8x32xf32>
    %30 = tpu.matmul %29, %14, %cst_10 {dimension_numbers = #tpu.dot_dimension_numbers<[2], [1], [1], [2], [0, 0, 0, 1, 1, 2], [0], [0]>} : vector<1x8x8xf32>, vector<1x8x32xf32>, vector<1x8x32xf32> -> vector<1x8x32xf32>
    "tpu.trace_stop"() : () -> ()
    %31 = vector.shape_cast %30 : vector<1x8x32xf32> to vector<8x32xf32>
    %c0_11 = arith.constant 0 : index
    %c0_12 = arith.constant 0 : index
    %c0_13 = arith.constant 0 : index
    %32 = vector.load %arg3[%c0_11, %c0_12, %c0_13] : memref<4x32x128xf32, #tpu.memory_space<vmem>>, vector<1x32x128xf32>
    %33 = vector.shape_cast %32 : vector<1x32x128xf32> to vector<32x128xf32>
    %cst_14 = arith.constant dense<0.000000e+00> : vector<8x128xf32>
    %34 = tpu.matmul %31, %33, %cst_14 {dimension_numbers = #tpu.dot_dimension_numbers<[1], [0], [0], [1], [0, 0, 1, 1], [], []>} : vector<8x32xf32>, vector<32x128xf32>, vector<8x128xf32> -> vector<8x128xf32>
    %35 = arith.addf %8, %34 : vector<8x128xf32>
    %36 = vector.extract_strided_slice %3 {offsets = [0, 32], sizes = [8, 32], strides = [1, 1]} : vector<8x384xf32> to vector<8x32xf32>
    %37 = vector.shape_cast %36 : vector<8x32xf32> to vector<1x8x32xf32>
    %38 = vector.extract_strided_slice %3 {offsets = [0, 160], sizes = [8, 32], strides = [1, 1]} : vector<8x384xf32> to vector<8x32xf32>
    %39 = vector.shape_cast %38 : vector<8x32xf32> to vector<1x8x32xf32>
    %40 = vector.extract_strided_slice %3 {offsets = [0, 288], sizes = [8, 32], strides = [1, 1]} : vector<8x384xf32> to vector<8x32xf32>
    %41 = vector.shape_cast %40 : vector<8x32xf32> to vector<1x8x32xf32>
    "tpu.trace_start"() <{level = 10 : i32, message = "btd,bsd->bts"}> : () -> ()
    %cst_15 = arith.constant dense<0.000000e+00> : vector<1x8x8xf32>
    %42 = tpu.matmul %37, %39, %cst_15 {dimension_numbers = #tpu.dot_dimension_numbers<[2], [2], [1], [1], [0, 0, 0, 1, 1, 1], [0], [0]>} : vector<1x8x32xf32>, vector<1x8x32xf32>, vector<1x8x8xf32> -> vector<1x8x8xf32>
    "tpu.trace_stop"() : () -> ()
    %cst_16 = arith.constant 0.109108947 : f32
    %43 = vector.broadcast %cst_16 : f32 to vector<1x8x8xf32>
    %44 = arith.mulf %42, %43 : vector<1x8x8xf32>
    %cst_17 = arith.constant -1.000000e+30 : f32
    %45 = vector.broadcast %cst_17 : f32 to vector<1x8x8xf32>
    %46 = arith.select %7, %44, %45 : vector<1x8x8xi1>, vector<1x8x8xf32>
    %cst_18 = arith.constant dense<0xFF800000> : vector<1x8xf32>
    %47 = vector.multi_reduction <maximumf>, %46, %cst_18 [2] : vector<1x8x8xf32> to vector<1x8xf32>
    %48 = vector.shape_cast %47 : vector<1x8xf32> to vector<1x8x1xf32>
    %49 = vector.broadcast %48 : vector<1x8x1xf32> to vector<1x8x8xf32>
    %50 = arith.subf %46, %49 : vector<1x8x8xf32>
    %51 = math.exp %50 : vector<1x8x8xf32>
    %cst_19 = arith.constant dense<0.000000e+00> : vector<1x8xf32>
    %52 = vector.multi_reduction <add>, %51, %cst_19 [2] : vector<1x8x8xf32> to vector<1x8xf32>
    %53 = vector.shape_cast %52 : vector<1x8xf32> to vector<1x8x1xf32>
    %54 = tpu.reciprocal %53 {approx = true} : vector<1x8x1xf32> -> vector<1x8x1xf32>
    %55 = vector.broadcast %54 : vector<1x8x1xf32> to vector<1x8x8xf32>
    %56 = arith.mulf %51, %55 : vector<1x8x8xf32>
    "tpu.trace_start"() <{level = 10 : i32, message = "bts,bsd->btd"}> : () -> ()
    %cst_20 = arith.constant dense<0.000000e+00> : vector<1x8x32xf32>
    %57 = tpu.matmul %56, %41, %cst_20 {dimension_numbers = #tpu.dot_dimension_numbers<[2], [1], [1], [2], [0, 0, 0, 1, 1, 2], [0], [0]>} : vector<1x8x8xf32>, vector<1x8x32xf32>, vector<1x8x32xf32> -> vector<1x8x32xf32>
    "tpu.trace_stop"() : () -> ()
    %58 = vector.shape_cast %57 : vector<1x8x32xf32> to vector<8x32xf32>
    %c1 = arith.constant 1 : index
    %c0_21 = arith.constant 0 : index
    %c0_22 = arith.constant 0 : index
    %59 = vector.load %arg3[%c1, %c0_21, %c0_22] : memref<4x32x128xf32, #tpu.memory_space<vmem>>, vector<1x32x128xf32>
    %60 = vector.shape_cast %59 : vector<1x32x128xf32> to vector<32x128xf32>
    %cst_23 = arith.constant dense<0.000000e+00> : vector<8x128xf32>
    %61 = tpu.matmul %58, %60, %cst_23 {dimension_numbers = #tpu.dot_dimension_numbers<[1], [0], [0], [1], [0, 0, 1, 1], [], []>} : vector<8x32xf32>, vector<32x128xf32>, vector<8x128xf32> -> vector<8x128xf32>
    %62 = arith.addf %35, %61 : vector<8x128xf32>
    %63 = vector.extract_strided_slice %3 {offsets = [0, 64], sizes = [8, 32], strides = [1, 1]} : vector<8x384xf32> to vector<8x32xf32>
    %64 = vector.shape_cast %63 : vector<8x32xf32> to vector<1x8x32xf32>
    %65 = vector.extract_strided_slice %3 {offsets = [0, 192], sizes = [8, 32], strides = [1, 1]} : vector<8x384xf32> to vector<8x32xf32>
    %66 = vector.shape_cast %65 : vector<8x32xf32> to vector<1x8x32xf32>
    %67 = vector.extract_strided_slice %3 {offsets = [0, 320], sizes = [8, 32], strides = [1, 1]} : vector<8x384xf32> to vector<8x32xf32>
    %68 = vector.shape_cast %67 : vector<8x32xf32> to vector<1x8x32xf32>
    "tpu.trace_start"() <{level = 10 : i32, message = "btd,bsd->bts"}> : () -> ()
    %cst_24 = arith.constant dense<0.000000e+00> : vector<1x8x8xf32>
    %69 = tpu.matmul %64, %66, %cst_24 {dimension_numbers = #tpu.dot_dimension_numbers<[2], [2], [1], [1], [0, 0, 0, 1, 1, 1], [0], [0]>} : vector<1x8x32xf32>, vector<1x8x32xf32>, vector<1x8x8xf32> -> vector<1x8x8xf32>
    "tpu.trace_stop"() : () -> ()
    %cst_25 = arith.constant 0.109108947 : f32
    %70 = vector.broadcast %cst_25 : f32 to vector<1x8x8xf32>
    %71 = arith.mulf %69, %70 : vector<1x8x8xf32>
    %cst_26 = arith.constant -1.000000e+30 : f32
    %72 = vector.broadcast %cst_26 : f32 to vector<1x8x8xf32>
    %73 = arith.select %7, %71, %72 : vector<1x8x8xi1>, vector<1x8x8xf32>
    %cst_27 = arith.constant dense<0xFF800000> : vector<1x8xf32>
    %74 = vector.multi_reduction <maximumf>, %73, %cst_27 [2] : vector<1x8x8xf32> to vector<1x8xf32>
    %75 = vector.shape_cast %74 : vector<1x8xf32> to vector<1x8x1xf32>
    %76 = vector.broadcast %75 : vector<1x8x1xf32> to vector<1x8x8xf32>
    %77 = arith.subf %73, %76 : vector<1x8x8xf32>
    %78 = math.exp %77 : vector<1x8x8xf32>
    %cst_28 = arith.constant dense<0.000000e+00> : vector<1x8xf32>
    %79 = vector.multi_reduction <add>, %78, %cst_28 [2] : vector<1x8x8xf32> to vector<1x8xf32>
    %80 = vector.shape_cast %79 : vector<1x8xf32> to vector<1x8x1xf32>
    %81 = tpu.reciprocal %80 {approx = true} : vector<1x8x1xf32> -> vector<1x8x1xf32>
    %82 = vector.broadcast %81 : vector<1x8x1xf32> to vector<1x8x8xf32>
    %83 = arith.mulf %78, %82 : vector<1x8x8xf32>
    "tpu.trace_start"() <{level = 10 : i32, message = "bts,bsd->btd"}> : () -> ()
    %cst_29 = arith.constant dense<0.000000e+00> : vector<1x8x32xf32>
    %84 = tpu.matmul %83, %68, %cst_29 {dimension_numbers = #tpu.dot_dimension_numbers<[2], [1], [1], [2], [0, 0, 0, 1, 1, 2], [0], [0]>} : vector<1x8x8xf32>, vector<1x8x32xf32>, vector<1x8x32xf32> -> vector<1x8x32xf32>
    "tpu.trace_stop"() : () -> ()
    %85 = vector.shape_cast %84 : vector<1x8x32xf32> to vector<8x32xf32>
    %c2 = arith.constant 2 : index
    %c0_30 = arith.constant 0 : index
    %c0_31 = arith.constant 0 : index
    %86 = vector.load %arg3[%c2, %c0_30, %c0_31] : memref<4x32x128xf32, #tpu.memory_space<vmem>>, vector<1x32x128xf32>
    %87 = vector.shape_cast %86 : vector<1x32x128xf32> to vector<32x128xf32>
    %cst_32 = arith.constant dense<0.000000e+00> : vector<8x128xf32>
    %88 = tpu.matmul %85, %87, %cst_32 {dimension_numbers = #tpu.dot_dimension_numbers<[1], [0], [0], [1], [0, 0, 1, 1], [], []>} : vector<8x32xf32>, vector<32x128xf32>, vector<8x128xf32> -> vector<8x128xf32>
    %89 = arith.addf %62, %88 : vector<8x128xf32>
    %90 = vector.extract_strided_slice %3 {offsets = [0, 96], sizes = [8, 32], strides = [1, 1]} : vector<8x384xf32> to vector<8x32xf32>
    %91 = vector.shape_cast %90 : vector<8x32xf32> to vector<1x8x32xf32>
    %92 = vector.extract_strided_slice %3 {offsets = [0, 224], sizes = [8, 32], strides = [1, 1]} : vector<8x384xf32> to vector<8x32xf32>
    %93 = vector.shape_cast %92 : vector<8x32xf32> to vector<1x8x32xf32>
    %94 = vector.extract_strided_slice %3 {offsets = [0, 352], sizes = [8, 32], strides = [1, 1]} : vector<8x384xf32> to vector<8x32xf32>
    %95 = vector.shape_cast %94 : vector<8x32xf32> to vector<1x8x32xf32>
    "tpu.trace_start"() <{level = 10 : i32, message = "btd,bsd->bts"}> : () -> ()
    %cst_33 = arith.constant dense<0.000000e+00> : vector<1x8x8xf32>
    %96 = tpu.matmul %91, %93, %cst_33 {dimension_numbers = #tpu.dot_dimension_numbers<[2], [2], [1], [1], [0, 0, 0, 1, 1, 1], [0], [0]>} : vector<1x8x32xf32>, vector<1x8x32xf32>, vector<1x8x8xf32> -> vector<1x8x8xf32>
    "tpu.trace_stop"() : () -> ()
    %cst_34 = arith.constant 0.109108947 : f32
    %97 = vector.broadcast %cst_34 : f32 to vector<1x8x8xf32>
    %98 = arith.mulf %96, %97 : vector<1x8x8xf32>
    %cst_35 = arith.constant -1.000000e+30 : f32
    %99 = vector.broadcast %cst_35 : f32 to vector<1x8x8xf32>
    %100 = arith.select %7, %98, %99 : vector<1x8x8xi1>, vector<1x8x8xf32>
    %cst_36 = arith.constant dense<0xFF800000> : vector<1x8xf32>
    %101 = vector.multi_reduction <maximumf>, %100, %cst_36 [2] : vector<1x8x8xf32> to vector<1x8xf32>
    %102 = vector.shape_cast %101 : vector<1x8xf32> to vector<1x8x1xf32>
    %103 = vector.broadcast %102 : vector<1x8x1xf32> to vector<1x8x8xf32>
    %104 = arith.subf %100, %103 : vector<1x8x8xf32>
    %105 = math.exp %104 : vector<1x8x8xf32>
    %cst_37 = arith.constant dense<0.000000e+00> : vector<1x8xf32>
    %106 = vector.multi_reduction <add>, %105, %cst_37 [2] : vector<1x8x8xf32> to vector<1x8xf32>
    %107 = vector.shape_cast %106 : vector<1x8xf32> to vector<1x8x1xf32>
    %108 = tpu.reciprocal %107 {approx = true} : vector<1x8x1xf32> -> vector<1x8x1xf32>
    %109 = vector.broadcast %108 : vector<1x8x1xf32> to vector<1x8x8xf32>
    %110 = arith.mulf %105, %109 : vector<1x8x8xf32>
    "tpu.trace_start"() <{level = 10 : i32, message = "bts,bsd->btd"}> : () -> ()
    %cst_38 = arith.constant dense<0.000000e+00> : vector<1x8x32xf32>
    %111 = tpu.matmul %110, %95, %cst_38 {dimension_numbers = #tpu.dot_dimension_numbers<[2], [1], [1], [2], [0, 0, 0, 1, 1, 2], [0], [0]>} : vector<1x8x8xf32>, vector<1x8x32xf32>, vector<1x8x32xf32> -> vector<1x8x32xf32>
    "tpu.trace_stop"() : () -> ()
    %112 = vector.shape_cast %111 : vector<1x8x32xf32> to vector<8x32xf32>
    %c3 = arith.constant 3 : index
    %c0_39 = arith.constant 0 : index
    %c0_40 = arith.constant 0 : index
    %113 = vector.load %arg3[%c3, %c0_39, %c0_40] : memref<4x32x128xf32, #tpu.memory_space<vmem>>, vector<1x32x128xf32>
    %114 = vector.shape_cast %113 : vector<1x32x128xf32> to vector<32x128xf32>
    %cst_41 = arith.constant dense<0.000000e+00> : vector<8x128xf32>
    %115 = tpu.matmul %112, %114, %cst_41 {dimension_numbers = #tpu.dot_dimension_numbers<[1], [0], [0], [1], [0, 0, 1, 1], [], []>} : vector<8x32xf32>, vector<32x128xf32>, vector<8x128xf32> -> vector<8x128xf32>
    %116 = arith.addf %89, %115 : vector<8x128xf32>
    %c0_42 = arith.constant 0 : index
    %c0_43 = arith.constant 0 : index
    %117 = vector.load %arg4[%c0_42, %c0_43] : memref<1x128xf32, #tpu.memory_space<vmem>>, vector<1x128xf32>
    %118 = vector.broadcast %117 : vector<1x128xf32> to vector<8x128xf32>
    %119 = arith.addf %116, %118 : vector<8x128xf32>
    %120 = vector.shape_cast %119 : vector<8x128xf32> to vector<1x8x128xf32>
    %c0_44 = arith.constant 0 : index
    %c0_45 = arith.constant 0 : index
    %c0_46 = arith.constant 0 : index
    %121 = vector.load %arg5[%c0_44, %c0_45, %c0_46] : memref<1x8x128xf32, #tpu.memory_space<vmem>>, vector<1x8x128xf32>
    tpu.vector_store %arg5[%c0_44, %c0_45, %c0_46], %120 {strides = array<i32>} : memref<1x8x128xf32, #tpu.memory_space<vmem>>, vector<1x8x128xf32>,
    return
  }
  func.func @transform_0(%arg0: i32) -> (i32, i32, i32) {
    %c0_i32 = arith.constant 0 : i32
    %c0_i32_0 = arith.constant 0 : i32
    %c0_i32_1 = arith.constant 0 : i32
    return %arg0, %c0_i32, %c0_i32_0 : i32, i32, i32
  }
  func.func @transform_1(%arg0: i32) -> (i32, i32) {
    %c0_i32 = arith.constant 0 : i32
    %c0_i32_0 = arith.constant 0 : i32
    %c0_i32_1 = arith.constant 0 : i32
    return %c0_i32, %c0_i32_0 : i32, i32
  }
  func.func @transform_2(%arg0: i32) -> (i32, i32, i32) {
    %c0_i32 = arith.constant 0 : i32
    %c0_i32_0 = arith.constant 0 : i32
    %c0_i32_1 = arith.constant 0 : i32
    %c0_i32_2 = arith.constant 0 : i32
    return %c0_i32, %c0_i32_0, %c0_i32_1 : i32, i32, i32
  }
  func.func @transform_3(%arg0: i32) -> (i32, i32) {
    %c0_i32 = arith.constant 0 : i32
    %c0_i32_0 = arith.constant 0 : i32
    %c0_i32_1 = arith.constant 0 : i32
    return %c0_i32, %c0_i32_0 : i32, i32
  }
  func.func @transform_4(%arg0: i32) -> (i32, i32, i32) {
    %c0_i32 = arith.constant 0 : i32
    %c0_i32_0 = arith.constant 0 : i32
    %c0_i32_1 = arith.constant 0 : i32
    return %arg0, %c0_i32, %c0_i32_0 : i32, i32, i32
  }
}

</mosaic_0001>

<bundles_post_ra>
// kernel: tpu_custom_call.1
= control target key start
LH: loop header
LB: loop body
LE: loop exit
PB: predicated region body
PF: predicated region fallthrough
CT: control target
= control target key end

     0   :  { %9 = vsyncpa [#allocation3], 0  ;;  %s2456_s0 = inlined_call_operand.hbm [shape: f32[2,8,128], index: 0, kind: input, shape index: {}]   ;;  %s2457_s1 = inlined_call_operand.hbm [shape: f32[128,384], index: 1, kind: input, shape index: {}]   ;;  %s2458_s2 = inlined_call_operand.hbm [shape: f32[4,32,128], index: 2, kind: input, shape index: {}]   ;;  %s2459_s3 = inlined_call_operand.vmem [shape: f32[1,128], index: 3, kind: input, shape index: {}]   ;;  %s2460_s4 = inlined_call_operand.hbm [shape: f32[2,8,128], index: 4, kind: output, shape index: {}]  }
   0x1   :  { %11 = vsyncpa [#allocation3 + $0x1], 0 }
   0x2   :  { %12 = vsyncpa [#allocation6], 0 }
   0x3   :  { %13 = vsyncpa [#allocation4], 0 }
   0x4   :  { %15 = vsyncpa [#allocation4 + $0x1], 0  ;;  %s2103_s15 = smov 0   ;;  %s2105_s16 = smov 0  }
   0x5   :  { %s2107_s17 = smov 0   ;;  %s2109_s18 = smov 0  }
   0x6 LB: > { %s2124_s19 = sadd.s32 4294967295, %s2062_s18   ;;  %s1528_s20 = sadd.s32 4294967294, %s2062_s18   ;;  %s2062_s18 = sphi %s2109_s18, %s2480_s18   ;;  %s2058_s17 = sphi %s2107_s17, %s2479_s17   ;;  %s2054_s16 = sphi %s2105_s16, %s2478_s16   ;;  %s2050_s15 = sphi %s2103_s15, %s2477_s15  }
   0x7   : > { %p41_p0 = scmp.ne.s32.totalorder %s2054_s16, %s2050_s15  ;;  %p2461_p1 = scmp.eq.s32.totalorder %s2124_s19, 0 }
   0x8   : > { %p134_p3 = scmp.eq.s32.totalorder %s1528_s20, 1  ;;  %p1529_p5 = scmp.ge.s32.totalorder %s2062_s18, 1 }
   0x9   : > { %p2133_p4 = por %p2461_p1, %p41_p0  ;;  %p141_p7 = scmp.lt.s32.totalorder %s2062_s18, 3 }
   0xa   : > { %p2138_p6 = por %p134_p3, %p41_p0  ;;  %s2064_s24 = smov [#allocation5]  }
   0xb   : > { %s2464_s21 = scalar_select %p2133_p4, 1, 0 }
   0xc   : > { %s2465_s22 = scalar_select %p2138_p6, 1, 0 }
   0xd   : > { %p2143_p8 = pnand %p1529_p5, %p141_p7  ;;  %s153_s25 = sshll.u32 %s2064_s24, 4  ;;  %s2147_s25 = int_to_ptr.vmem [resolvable:$true] %s153_s25 }
   0xe   : > { %s2065_s27 = smov [#allocation7]   ;;  %s1906_s5 = scalar_lea.hbm %s2457_s1, 6144 }
   0xf   : > { %p1825_p9 = pneg %p2143_p8  ;;  %s166_s28 = sshll.u32 %s2065_s27, 4  ;;  %s2158_s28 = int_to_ptr.vmem [resolvable:$true] %s166_s28 }
  0x10   : > { %p1907_p12 = scmp.ne.s32.totalorder %s2457_s1, %s1906_s5  ;;  %p1913_p5 = scmp.lt.u32.totalorder %s1906_s5, %s2457_s1 }
  0x11   : > { %p2154_p11 = pnand %p1825_p9, %p2461_p1 }
  0x13   : > { %p1908_p13 = pneg %p2154_p11 }
  0x15   : > { %p1909_p0 = pnand %p1908_p13, %p1907_p12 }
  0x17   : > { %p1910_p3 = pneg %p1909_p0 }
  0x19   : > { %p1915_p7 = pnand %p1913_p5, %p1910_p3 }
  0x1b   : > { %1918 = shalt.err (!%p1915_p7)
}
  0x1c   : > { %s1919_s10 = scalar_lea.vmem %s2147_s25, 6144  ;;  %p1927_p2 = scmp.lt.s32.totalorder %s2147_s25, %s2147_s25 }
  0x1d   : > { %p1920_p9 = scmp.ne.s32.totalorder %s2147_s25, %s1919_s10  ;;  %p1928_p12 = scmp.lt.s32.totalorder %s1919_s10, %s1919_s10 }
  0x1f   : > { %p1922_p10 = pnand %p1920_p9, %p1908_p13  ;;  %p1929_p0 = por %p1928_p12, %p1927_p2 }
  0x21   : > { %p1923_p1 = pneg %p1922_p10 }
  0x23   : > { %p1930_p6 = pnand %p1929_p0, %p1923_p1 }
  0x25   : > { %1933 = shalt.err (!%p1930_p6)
}
  0x26   : > { %s2066_s11 = smov 384   ;;  %s2067_s12 = smov 24  }
  0x27   : > { %1828 = dma.hbm_to_vmem [thread:$0]  (!%p2154_p11), %s2457_s1, 6144, %s2147_s25, [#allocation6], %s2066_s11, %s2066_s11, %s2067_s12  }
  0x28   : > { %s1934_s27 = scalar_lea.hbm %s2458_s2, 2048 }
  0x29   : > { %p1935_p2 = scmp.ne.s32.totalorder %s2458_s2, %s1934_s27  ;;  %p1941_p10 = scmp.lt.u32.totalorder %s1934_s27, %s2458_s2 }
  0x2b   : > { %p1937_p1 = pnand %p1935_p2, %p1908_p13 }
  0x2d   : > { %p1938_p6 = pneg %p1937_p1 }
  0x2f   : > { %p1943_p3 = pnand %p1941_p10, %p1938_p6 }
  0x31   : > { %1946 = shalt.err (!%p1943_p3)
}
  0x32   : > { %s1947_s25 = scalar_lea.vmem %s2158_s28, 2048  ;;  %p1955_p12 = scmp.lt.s32.totalorder %s2158_s28, %s2158_s28 }
  0x33   : > { %p1948_p5 = scmp.ne.s32.totalorder %s2158_s28, %s1947_s25  ;;  %p1956_p0 = scmp.lt.s32.totalorder %s1947_s25, %s1947_s25 }
  0x35   : > { %p1950_p7 = pnand %p1948_p5, %p1908_p13  ;;  %p1957_p2 = por %p1956_p0, %p1955_p12 }
  0x37   : > { %p1951_p9 = pneg %p1950_p7 }
  0x39   : > { %p1958_p1 = pnand %p1957_p2, %p1951_p9 }
  0x3b   : > { %1961 = shalt.err (!%p1958_p1)
}
  0x3c   : > { %s2068_s7 = smov 128   ;;  %s2069_s8 = smov 8  }
  0x3d   : > { %1831 = dma.hbm_to_vmem [thread:$0]  (!%p2154_p11), %s2458_s2, 2048, %s2158_s28, [#allocation6], %s2068_s7, %s2068_s7, %s2069_s8  }
  0x3e   : > { %s2213_s11 = sadd.s32 1, %s2062_s18   ;;  %s28_s13 = sadd.s32 1, %s2058_s17 }
  0x3f   : > { %s25_s12 = ssub.s32 %s2062_s18, %s2213_s11  ;;  %p35_p6 = scmp.ne.s32.totalorder %s2058_s17, %s2054_s16 }
  0x40   : > { %p26_p13 = scmp.eq.s32.totalorder %s25_s12, 0  ;;  %p36_p10 = scmp.eq.s32.totalorder %s2062_s18, 0 }
  0x41   : > { %p2468_p5 = scmp.eq.s32.totalorder %s2124_s19, 1  ;;  %p1842_p9 = scmp.lt.s32.totalorder %s2062_s18, 2 }
  0x42   : > { %s2222_s14 = scalar_select %p26_p13, %s2058_s17, %s28_s13  }
  0x43   : > { %p37_p3 = por %p36_p10, %p35_p6  ;;  %p2226_p7 = por %p2468_p5, %p35_p6 }
  0x44   : > { %s183_s26 = sand.u32 1, %s2058_s17   ;;  %s1534_s28 = sshll.u32 %s2062_s18, 7 }
  0x45   : > { %s2469_s20 = scalar_select %p2226_p7, 1, 0 }
  0x46   : > { %s1533_s24 = sshll.u32 %s183_s26, 3  ;;  %s2236_s30 = scalar_lea.hbm %s2456_s0, %s1534_s28 }
  0x47   : > { %s187_s5 = scalar_lea.vmem [#allocation2], %s1533_s24  ;;  %p2240_p11 = pnand %p1842_p9, %p37_p3 }
  0x48   : > { %s194_s6 = sshll.u32 %s187_s5, 4  ;;  %s184_s7 = scalar_lea.sflag [#allocation3], %s183_s26  ;;  %s2238_s6 = int_to_ptr.vmem [resolvable:$true] %s194_s6 }
  0x49   : > { %s1962_s8 = scalar_lea.hbm %s2236_s30, 128  ;;  %p1964_p0 = pneg %p2240_p11 }
  0x4a   : > { %p1963_p12 = scmp.ne.s32.totalorder %s2236_s30, %s1962_s8  ;;  %s1967_s12 = scalar_lea.hbm %s2456_s0, 256 }
  0x4b   : > { %p1968_p13 = scmp.lt.u32.totalorder %s2236_s30, %s2456_s0  ;;  %p1969_p6 = scmp.lt.u32.totalorder %s1967_s12, %s1962_s8 }
  0x4c   : > { %p1965_p2 = pnand %p1964_p0, %p1963_p12  ;;  %p1971_p3 = scmp.lt.u32.totalorder %s1962_s8, %s2236_s30 }
  0x4d   : > { %p1970_p10 = por %p1969_p6, %p1968_p13 }
  0x4e   : > { %p1966_p1 = pneg %p1965_p2 }
  0x4f   : > { %p1972_p5 = por %p1971_p3, %p1970_p10 }
  0x51   : > { %p1973_p9 = pnand %p1972_p5, %p1966_p1 }
  0x53   : > { %1976 = shalt.err (!%p1973_p9)
}
  0x54   : > { %s1977_s26 = scalar_lea.vmem %s2238_s6, 128  ;;  %s2070_s28 = smov [#allocation2]  }
  0x55   : > { %p1978_p12 = scmp.ne.s32.totalorder %s2238_s6, %s1977_s26  ;;  %s1982_s27 = sshll.u32 %s2070_s28, 4  ;;  %s1983_s27 = int_to_ptr.vmem [resolvable:$false] %s1982_s27 }
  0x56   : > { %s1984_s29 = scalar_lea.vmem %s1983_s27, 256  ;;  %p1985_p4 = scmp.lt.s32.totalorder %s2238_s6, %s1983_s27 }
  0x57   : > { %p1980_p2 = pnand %p1978_p12, %p1964_p0  ;;  %p1986_p13 = scmp.lt.s32.totalorder %s1984_s29, %s1977_s26 }
  0x59   : > { %p1981_p7 = pneg %p1980_p2  ;;  %p1987_p6 = por %p1986_p13, %p1985_p4 }
  0x5b   : > { %p1988_p10 = pnand %p1987_p6, %p1981_p7 }
  0x5d   : > { %1991 = shalt.err (!%p1988_p10)
}
  0x5e   : > { %1835 = dma.hbm_to_vmem [thread:$0]  (!%p2240_p11), %s2236_s30, 128, %s2238_s6, %s184_s7  }
  0x5f   : > { %203 = sbr.rel (%p2143_p8) target bundleno = 2722 (0xaa2), region = 36  ;;  %s2272_s5 = sand.u32 (!%p2143_p8), 1, %s2054_s16  }
  0x60   : > { %s1536_s8 = sshll.u32 (!%p2143_p8), %s2272_s5, 3  ;;  %s206_s9 = scalar_lea.sflag (!%p2143_p8), [#allocation3], %s2272_s5 }
  0x61   : > { %s2278_s10 = scalar_lea.vmem (!%p2143_p8), [#allocation2], %s1536_s8  ;;  %p2471_p4 = scmp.ne.s32.totalorder (!%p2143_p8), %s2464_s21, 0 }
  0x66   : > { %2037 = dma.done.wait (%p2471_p4), %s206_s9, 128  }
  0x67   : > { %2039 = vsyncadd (%p2471_p4), %s206_s9, 4294967168  ;;  %p2472_p7 = scmp.eq.s32.totalorder %s2124_s19, 0 }
  0x69   : > { %2041 = dma.done.wait (%p2472_p7), [#allocation6], 8192   ;;  %p2473_p8 = pmov %p2472_p7 }
  0x6a   : > { %v2071_v0 = vmov 0.0   ;;  %v2072_v1 = vmov 0.0|0.0   ;;  %v244_v2 = vld [vmem:[#allocation5 + $0x8] sm:$0xff]  ;;  %v247_v3 = vld [vmem:[#allocation5 + $0x20] sm:$0xff]  ;;  %v246_v6 = vld [vmem:[#allocation5 + $0x18] sm:$0xff]  ;;  %vm2073_vm0 = vmmov 0  }
  0x6b   : > { %2043 = vsyncadd (%p2473_p8), [#allocation6], 4294959104  ;;  %355 = vmatprep.mubr.f32.mxu0 %v2071_v0  ;;  %1765 = vmatprep.subr.bf16.mxu1 %v2072_v1  ;;  %v243_v4 = vld [vmem:[#allocation5] sm:$0xff]  ;;  %v1733_v5 = vpack.c.bf16 %v247_v3, %v244_v2  ;;  %v250_v7 = vld [vmem:[#allocation5 + $0x38] sm:$0xff]  ;;  %vm437_vm1 = vcmask 261120   ;;  %s2074_s21 = smov 96  }
  0x6c   : > { %v253_v8 = vld [vmem:[#allocation5 + $0x50] sm:$0xff]  ;;  %v1735_v9 = vpack.c.bf16 %v246_v6, %v243_v4  ;;  %v252_v12 = vld [vmem:[#allocation5 + $0x48] sm:$0xff]  ;;  %v259_v14 = vld [vmem:[#allocation5 + $0x80] sm:$0xff]  ;;  %1646 = vmatprep.mubr.msk.f32.mxu1 %vm2073_vm0, %v2071_v0  ;;  %vm516_vm3 = vcmask 64512   ;;  %s2075_s23 = smov 64   ;;  %s2076_s30 = smov 32  }
  0x6d   : > { %v1737_v10 = vpack.c.bf16 %v253_v8, %v250_v7  ;;  %v249_v11 = vld [vmem:[#allocation5 + $0x30] sm:$0xff]  ;;  %v256_v13 = vld [vmem:[#allocation5 + $0x68] sm:$0xff]  ;;  %1734 = vmatprep.subr.bf16.mxu0 %v1733_v5  ;;  %v255_v17 = vld [vmem:[#allocation5 + $0x60] sm:$0xff]  ;;  %s1558_s7 = sshll.u32 %s2124_s19, 7  ;;  %s241_s12 = scalar_lea.vmem [#allocation8], %s1536_s8 }
  0x6e   : > { %1736 = vmatpush1.bf16.msra.mxu0 %v1735_v9  ;;  %v1739_v15 = vpack.c.bf16 %v252_v12, %v249_v11  ;;  %v1741_v16 = vpack.c.bf16 %v259_v14, %v256_v13  ;;  %v258_v18 = vld [vmem:[#allocation5 + $0x78] sm:$0xff]  ;;  %v265_v20 = vld [vmem:[#allocation5 + $0xb0] sm:$0xff]  ;;  %v264_v24 = vld [vmem:[#allocation5 + $0xa8] sm:$0xff]  ;;  %s1439_s13 = sshll.u32 %s241_s12, 4  ;;  %s2412_s28 = scalar_lea.hbm %s2460_s4, %s1558_s7  ;;  %s2414_s13 = int_to_ptr.vmem [resolvable:$true] %s1439_s13 }
  0x6f   : > { %1738 = vmatprep.subr.bf16.mxu0 %v1737_v10  ;;  %v262_v19 = vld [vmem:[#allocation5 + $0x98] sm:$0xff]  ;;  %v1743_v21 = vpack.c.bf16 %v258_v18, %v255_v17  ;;  %v261_v23 = vld [vmem:[#allocation5 + $0x90] sm:$0xff]  ;;  %v268_v25 = vld [vmem:[#allocation5 + $0xc8] sm:$0xff]  ;;  %s1426_s27 = scalar_lea.sflag [#allocation4], %s2272_s5  ;;  %s1992_s29 = scalar_lea.vmem %s2414_s13, 128 }
  0x70   : > { %v1745_v22 = vpack.c.bf16 %v265_v20, %v262_v19  ;;  %v271_v26 = vld [vmem:[#allocation5 + $0xe0] sm:$0xff]  ;;  %v245_v27 = vld [vmem:[#allocation5 + $0x10] sm:$0xff]  ;;  %v248_v28 = vld [vmem:[#allocation5 + $0x28] sm:$0xff]  ;;  %v1747_v30 = vpack.c.bf16 %v264_v24, %v261_v23  ;;  %v432_v19 = vlaneseq  ;;  %p1993_p11 = scmp.ne.s32.totalorder %s2414_s13, %s1992_s29  ;;  %p2474_p0 = scmp.ne.s32.totalorder %s2469_s20, 0 }
  0x71   : > { %v251_v29 = vld [vmem:[#allocation5 + $0x40] sm:$0xff]  ;;  %v1766_v31 = vpack.c.bf16 %v248_v28, %v245_v27  ;;  %v254_v32 = vld [vmem:[#allocation5 + $0x58] sm:$0xff]  ;;  %v1749_v33 = vpack.c.bf16 %v271_v26, %v268_v25  ;;  %v277_v37 = vld [vmem:[#allocation5 + $0x110] sm:$0xff]  ;;  %s2077_s19 = smov [#allocation8]  }
  0x72   : > { %1740 = vmatpush1.bf16.msra.mxu0 %v1739_v15  ;;  %v267_v34 = vld [vmem:[#allocation5 + $0xc0] sm:$0xff]  ;;  %v270_v35 = vld [vmem:[#allocation5 + $0xd8] sm:$0xff]  ;;  %v1769_v38 = vpack.c.bf16 %v254_v32, %v251_v29  ;;  %v257_v39 = vld [vmem:[#allocation5 + $0x70] sm:$0xff]  ;;  %v2326_v20 = vshrl.u32 %v432_v19, 7  ;;  %p1994_p1 = pnand %p1993_p11, %p2474_p0  ;;  %s1996_s8 = sshll.u32 %s2077_s19, 4  ;;  %s1997_s8 = int_to_ptr.vmem [resolvable:$false] %s1996_s8 }
  0x73   : > { %1742 = vmatprep.subr.bf16.mxu0 %v1741_v16  ;;  %v274_v36 = vld [vmem:[#allocation5 + $0xf8] sm:$0xff]  ;;  %1767 = vmatpush3.bf16.msra.mxu1 %v1766_v31  ;;  %v260_v40 = vld [vmem:[#allocation5 + $0x88] sm:$0xff]  ;;  %v1751_v41 = vpack.c.bf16 %v270_v35, %v267_v34  ;;  %v273_v43 = vld [vmem:[#allocation5 + $0xf0] sm:$0xff]  ;;  %s1998_s9 = scalar_lea.vmem %s1997_s8, 256  ;;  %p1999_p5 = scmp.lt.s32.totalorder %s2414_s13, %s1997_s8 }
  0x74   : > { %1768 = vmatprep.subr.bf16.mxu1 %v2072_v1  ;;  %v1753_v42 = vpack.c.bf16 %v277_v37, %v274_v36  ;;  %v276_v44 = vld [vmem:[#allocation5 + $0x108] sm:$0xff]  ;;  %v283_v46 = vld [vmem:[#allocation5 + $0x140] sm:$0xff]  ;;  %v1772_v47 = vpack.c.bf16 %v260_v40, %v257_v39  ;;  %v266_v49 = vld [vmem:[#allocation5 + $0xb8] sm:$0xff]  ;;  %p1995_p3 = pneg %p1994_p1  ;;  %p2000_p9 = scmp.lt.s32.totalorder %s1998_s9, %s1992_s29 }
  0x75   : > { %v280_v45 = vld [vmem:[#allocation5 + $0x128] sm:$0xff]  ;;  %v263_v48 = vld [vmem:[#allocation5 + $0xa0] sm:$0xff]  ;;  %v1755_v50 = vpack.c.bf16 %v276_v44, %v273_v43  ;;  %v282_v53 = vld [vmem:[#allocation5 + $0x138] sm:$0xff] }
  0x76   : > { %1744 = vmatpush1.bf16.msra.mxu0 %v1743_v21  ;;  %v1757_v51 = vpack.c.bf16 %v283_v46, %v280_v45  ;;  %v279_v52 = vld [vmem:[#allocation5 + $0x120] sm:$0xff]  ;;  %v286_v54 = vld [vmem:[#allocation5 + $0x158] sm:$0xff]  ;;  %v289_v55 = vld [vmem:[#allocation5 + $0x170] sm:$0xff]  ;;  %v1775_v56 = vpack.c.bf16 %v266_v49, %v263_v48  ;;  %v2328_v21 = vand.u32 127, %v432_v19  ;;  %p2001_p12 = por %p2000_p9, %p1999_p5 }
  0x77   : > { %1746 = vmatprep.subr.bf16.mxu0 %v1745_v22  ;;  %1770 = vmatpush3.bf16.msra.mxu1 %v1769_v38  ;;  %v269_v57 = vld [vmem:[#allocation5 + $0xd0] sm:$0xff]  ;;  %v272_v58 = vld [vmem:[#allocation5 + $0xe8] sm:$0xff]  ;;  %v1759_v59 = vpack.c.bf16 %v282_v53, %v279_v52  ;;  %v1761_v60 = vpack.c.bf16 %v289_v55, %v286_v54  ;;  %v275_v2 = vld [vmem:[#allocation5 + $0x100] sm:$0xff] }
  0x78   : > { %1771 = vmatprep.subr.bf16.mxu1 %v2072_v1  ;;  %v285_v61 = vld [vmem:[#allocation5 + $0x150] sm:$0xff]  ;;  %v288_v62 = vld [vmem:[#allocation5 + $0x168] sm:$0xff]  ;;  %v1778_v63 = vpack.c.bf16 %v272_v58, %v269_v57  ;;  %v278_v3 = vld [vmem:[#allocation5 + $0x118] sm:$0xff]  ;;  %vm436_vm2 = vcmp.ge.s32.totalorder %v2326_v20, %v2328_v21  ;;  %p2002_p2 = pnand %p2001_p12, %p1995_p3 }
  0x79   : > { %v1763_v4 = vpack.c.bf16 %v288_v62, %v285_v61  ;;  %v1781_v5 = vpack.c.bf16 %v278_v3, %v275_v2  ;;  %v281_v6 = vld [vmem:[#allocation5 + $0x130] sm:$0xff]  ;;  %v284_v7 = vld [vmem:[#allocation5 + $0x148] sm:$0xff]  ;;  %v287_v10 = vld [vmem:[#allocation5 + $0x160] sm:$0xff] }
  0x7a   : > { %1748 = vmatpush1.bf16.msra.mxu0 %v1747_v30  ;;  %v242_v8 = vld [vmem:[%s2278_s10] sm:$0xff]  ;;  %v1784_v9 = vpack.c.bf16 %v284_v7, %v281_v6  ;;  %v774_v45 = vld [vmem:[#allocation7 + $0x20] sm:$0xff]  ;;  %v775_v46 = vld [vmem:[#allocation7 + $0x28] sm:$0xff] }
  0x7b   : > { %1750 = vmatprep.subr.bf16.mxu0 %v1749_v33  ;;  %1773 = vmatpush3.bf16.msra.mxu1 %v1772_v47  ;;  %v290_v11 = vld [vmem:[#allocation5 + $0x178] sm:$0xff]  ;;  %v776_v47 = vld [vmem:[#allocation7 + $0x30] sm:$0xff]  ;;  %v1790_v48 = vpack.c.bf16 %v775_v46, %v774_v45  ;;  %v601_v53 = vld [vmem:[#allocation7] sm:$0xff] }
  0x7c   : > { %1774 = vmatprep.subr.bf16.mxu1 %v2072_v1  ;;  %v1787_v12 = vpack.c.bf16 %v290_v11, %v287_v10  ;;  %v777_v49 = vld [vmem:[#allocation7 + $0x38] sm:$0xff]  ;;  %v602_v54 = vld [vmem:[#allocation7 + $0x8] sm:$0xff]  ;;  %v603_v58 = vld [vmem:[#allocation7 + $0x10] sm:$0xff] }
  0x7d   : > { %v1341_v20 = vld [vmem:[#allocation7 + $0x78] sm:$0xff] }
  0x7e   : > { %1752 = vmatpush1.bf16.msra.mxu0 %v1751_v41 }
  0x7f   : > { %1754 = vmatprep.subr.bf16.mxu0 %v1753_v42  ;;  %1776 = vmatpush3.bf16.msra.mxu1 %v1775_v56  ;;  %v1796_v56 = vpack.c.bf16 %v602_v54, %v601_v53 }
  0x80   : > { %1777 = vmatprep.subr.bf16.mxu1 %v2072_v1 }
  0x82   : > { %1756 = vmatpush1.bf16.msra.mxu0 %v1755_v50  ;;  %v1793_v50 = vpack.c.bf16 %v777_v49, %v776_v47  ;;  %v1339_v47 = vld [vmem:[#allocation7 + $0x68] sm:$0xff] }
  0x83   : > { %1758 = vmatprep.subr.bf16.mxu0 %v1757_v51  ;;  %1779 = vmatpush3.bf16.msra.mxu1 %v1778_v63 }
  0x84   : > { %1780 = vmatprep.subr.bf16.mxu1 %v2072_v1 }
  0x86   : > { %1760 = vmatpush1.bf16.msra.mxu0 %v1759_v59  ;;  %v604_v59 = vld [vmem:[#allocation7 + $0x18] sm:$0xff] }
  0x87   : > { %1762 = vmatprep.subr.bf16.mxu0 %v1761_v60  ;;  %1782 = vmatpush3.bf16.msra.mxu1 %v1781_v5  ;;  %v1799_v60 = vpack.c.bf16 %v604_v59, %v603_v58  ;;  %v1556_v58 = vld [vmem:[%s2459_s3] ss:$0 sm:$0xff] }
  0x88   : > { %1783 = vmatprep.subr.bf16.mxu1 %v2072_v1 }
  0x8a   : > { %1764 = vmatpush1.bf16.msra.mxu0 %v1763_v4 }
  0x8b   : > { %1659 = vmatprep.subr.mxu0 %v2071_v0  ;;  %1785 = vmatpush3.bf16.msra.mxu1 %v1784_v9 }
  0x8c   : > { %1786 = vmatprep.subr.bf16.mxu1 %v2072_v1 }
  0x8d   : > { %356 = vmatmul.mubr.f32.vlgmr.msra.gmra.mrb[0].mxu0 %v242_v8 }
  0x8e   : > { %1661 = vmatprep.mubr.msk.f32.mxu0 %vm2073_vm0, %v2071_v0 }
  0x8f   : > { %1788 = vmatpush3.bf16.msra.mxu1 %v1787_v12 }
  0x90   : > { %1649 = vmatprep.subr.mxu1 %v2071_v0 }
  0x92   : > { %1647 = vmatmul.mubr.f32.vlgmr.msra.gmra.mrb[0].mxu1 %v242_v8 }
  0x93   : > { %1651 = vmatprep.mubr.msk.f32.mxu1 %vm2073_vm0, %v2071_v0 }
 0x160   : > { %v2306_v13 = vpop.f32.mrb[0].mxu0 }
 0x161   : > { %v359_v14 = vpop.f32.mrb[1].mxu0 }
 0x162   : > { %607 = vrot.lane.b32.xlu0 %v359_v14, %s2074_s21  ;;  %1650 = vmatpush3.xpose.msk.msra.mxu1 %vm437_vm1, %v359_v14 }
 0x163   : > { %1654 = vmatprep.subr.mxu1 %v2071_v0 }
 0x165   : > { %1652 = vmatmul.mubr.msk.f32.vlgmr.msra.gmra.mrb[2].mxu1 %vm437_vm1, %v2306_v13  ;;  %v2317_v15 = vpop.f32.mrb[0].mxu1 }
 0x166   : > { %605 = vrot.lane.b32.xlu0 %v2306_v13, %s2074_s21  ;;  %1656 = vmatprep.mubr.msk.f32.mxu1 %vm2073_vm0, %v2071_v0  ;;  %v1648_v16 = vpop.f32.mrb[1].mxu1 }
 0x167   : > { %1655 = vmatpush3.msra.mxu1 %v2317_v15 }
 0x168   : > { %1664 = vmatprep.subr.mxu1 %v2071_v0 }
 0x1d4   : > { %v608_v17 = vpop.permute.xlu0 %607 }
 0x1d5   : > { %1660 = vmatpush3.xpose.msk.msra.mxu0 %vm437_vm1, %v608_v17 }
 0x1d6   : > { %1789 = vmatprep.subr.bf16.mxu0 %v2072_v1 }
 0x1d8   : > { %v606_v18 = vpop.permute.xlu0 %605 }
 0x1d9   : > { %1662 = vmatmul.mubr.msk.f32.vlgmr.msra.gmra.mrb[2].mxu0 %vm437_vm1, %v606_v18 }
 0x1da   : > { %1677 = vmatprep.mubr.msk.f32.mxu0 %vm2073_vm0, %v2071_v0  ;;  %1791 = vmatpush3.bf16.msra.mxu0 %v1790_v48  ;;  %v1340_v48 = vld [vmem:[#allocation7 + $0x70] sm:$0xff] }
 0x1db   : > { %1792 = vmatprep.subr.bf16.mxu0 %v2072_v1  ;;  %v1811_v21 = vpack.c.bf16 %v1341_v20, %v1340_v48 }
 0x1de   : > { %1794 = vmatpush3.bf16.msra.mxu0 %v1793_v50 }
 0x1df   : > { %1691 = vmatprep.subr.mxu0 %v2071_v0 }
 0x238   : > { %v510_v22 = vpop.f32.mrb[2].mxu1 }
 0x239   : > { %v514_v23 = vmul.f32 0.10910895, %v510_v22  ;;  %v1653_v24 = vpop.f32.mrb[3].mxu1 }
 0x23b   : > { %v515_v25 = vsel %vm436_vm2, %v514_v23, -1e+30 }
 0x23c   : > { %v517_v26 = vsel %vm516_vm3, %v515_v25, -inf }
 0x23d   : > { %518 = vmax.xlane.f32.xlu1 %v517_v26  ;;  %v1093_v26 = vld [vmem:[#allocation7 + $0x48] sm:$0xff] }
 0x2ac   : > { %v679_v27 = vpop.f32.mrb[2].mxu0 }
 0x2ad   : > { %v683_v28 = vmul.f32 0.10910895, %v679_v27  ;;  %v1663_v29 = vpop.f32.mrb[3].mxu0  ;;  %v1094_v27 = vld [vmem:[#allocation7 + $0x50] sm:$0xff] }
 0x2ae   : > { %v1095_v29 = vld [vmem:[#allocation7 + $0x58] sm:$0xff] }
 0x2af   : > { %v684_v30 = vsel %vm436_vm2, %v683_v28, -1e+30 }
 0x2b0   : > { %v685_v31 = vsel %vm516_vm3, %v684_v30, -inf }
 0x2b1   : > { %686 = vmax.xlane.f32.xlu1 %v685_v31 }
 0x2ca   : > { %v519_v32 = vpop.xlane.xlu1 %518 }
 0x2cb   : > { %v520_v33 = vsub.f32 %v515_v25, %v519_v32  ;;  %v1092_v25 = vld [vmem:[#allocation7 + $0x40] sm:$0xff] }
 0x2cc   : > { %v1802_v28 = vpack.c.bf16 %v1093_v26, %v1092_v25 }
 0x2cd   : > { %v521_v34 = vmul.f32 1.442695, %v520_v33 }
 0x2cf   : > { %1890 = vpow2.f32 %v521_v34 }
 0x2d9   : > { %v1891_v35 = vpop.eup %1890 }
 0x2da   : > { %v523_v36 = vsel %vm516_vm3, %v1891_v35, 0.0 }
 0x2db   : > { %524 = vadd.xlane.f32.xlu0 %v523_v36 }
 0x2f1   : > { %1015 = vrot.lane.b32.xlu0 %v2317_v15, %s2075_s23 }
 0x2f5   : > { %1172 = vrot.lane.b32.xlu0 %v359_v14, %s2076_s30 }
 0x33e   : > { %v687_v37 = vpop.xlane.xlu1 %686 }
 0x33f   : > { %v688_v38 = vsub.f32 %v684_v30, %v687_v37  ;;  %v1805_v30 = vpack.c.bf16 %v1095_v29, %v1094_v27 }
 0x341   : > { %v689_v39 = vmul.f32 1.442695, %v688_v38 }
 0x343   : > { %1892 = vpow2.f32 %v689_v39 }
 0x34d   : > { %v1893_v40 = vpop.eup %1892 }
 0x34e   : > { %v691_v41 = vsel %vm516_vm3, %v1893_v40, 0.0 }
 0x34f   : > { %692 = vadd.xlane.f32.xlu1 %v691_v41 }
 0x360   : > { %697 = vrot.lane.b32.xlu1 %v2317_v15, %s2074_s21 }
 0x364   : > { %926 = vrot.lane.b32.xlu1 %v359_v14, %s2075_s23 }
 0x368   : > { %v525_v42 = vpop.xlane.xlu0 %524  ;;  %924 = vrot.lane.b32.xlu1 %v2306_v13, %s2075_s23 }
 0x369   : > { %1894 = vrcp.f32 %v525_v42 }
 0x36c   : > { %v1016_v62 = vpop.permute.xlu0 %1015 }
 0x370   : > { %v1173_v31 = vpop.permute.xlu0 %1172 }
 0x373   : > { %v1895_v43 = vpop.eup %1894 }
 0x374   : > { %v527_v44 = vmul.f32 %v1895_v43, %v1891_v35 }
 0x376   : > { %1657 = vmatmul.mubr.msk.f32.vlgmr.msra.gmra.mrb[4].mxu1 %vm516_vm3, %v527_v44 }
 0x377   : > { %1666 = vmatprep.mubr.msk.f32.mxu1 %vm2073_vm0, %v2071_v0 }
 0x3dc   : > { %v693_v51 = vpop.xlane.xlu1 %692 }
 0x3dd   : > { %1896 = vrcp.f32 %v693_v51 }
 0x3e0   : > { %v698_v52 = vpop.permute.xlu1 %697 }
 0x3e1   : > { %1665 = vmatpush3.msra.mxu1 %v698_v52 }
 0x3e2   : > { %1795 = vmatprep.subr.bf16.mxu1 %v2072_v1 }
 0x3e4   : > { %v927_v2 = vpop.permute.xlu1 %926 }
 0x3e7   : > { %v1897_v55 = vpop.eup %1896 }
 0x3e8   : > { %v695_v57 = vmul.f32 %v1897_v55, %v1893_v40  ;;  %v925_v5 = vpop.permute.xlu1 %924 }
 0x3ea   : > { %1667 = vmatmul.mubr.msk.f32.vlgmr.msra.gmra.mrb[6].mxu1 %vm516_vm3, %v695_v57 }
 0x3eb   : > { %1797 = vmatpush3.bf16.msra.mxu1 %v1796_v56  ;;  %1688 = vmatprep.mubr.msk.f32.mxu1 %vm2073_vm0, %v2071_v0 }
 0x3ec   : > { %1798 = vmatprep.subr.bf16.mxu1 %v2072_v1 }
 0x3ef   : > { %1800 = vmatpush3.bf16.msra.mxu1 %v1799_v60 }
 0x3f0   : > { %1696 = vmatprep.subr.mxu1 %v2071_v0 }
 0x449   : > { %v597_v61 = vpop.f32.mrb[4].mxu1 }
 0x44a   : > { %v1658_v63 = vpop.f32.mrb[5].mxu1  ;;  %1689 = vmatmul.mubr.msk.f32.vlgmr.msra.gmra.mrb[8].mxu1 %vm437_vm1, %v597_v61 }
 0x44b   : > { %1697 = vmatpush3.msra.mxu1 %v1016_v62  ;;  %1698 = vmatprep.mubr.msk.f32.mxu1 %vm2073_vm0, %v2071_v0 }
 0x44c   : > { %1712 = vmatprep.subr.mxu1 %v2071_v0 }
 0x4bd   : > { %v769_v3 = vpop.f32.mrb[6].mxu1 }
 0x4be   : > { %v1668_v4 = vpop.f32.mrb[7].mxu1  ;;  %1678 = vmatmul.mubr.msk.f32.vlgmr.msra.gmra.mrb[4].mxu0 %vm437_vm1, %v769_v3 }
 0x4bf   : > { %1692 = vmatpush3.xpose.msk.msra.mxu0 %vm437_vm1, %v927_v2  ;;  %1693 = vmatprep.mubr.msk.f32.mxu0 %vm2073_vm0, %v2071_v0 }
 0x4c0   : > { %1801 = vmatprep.subr.bf16.mxu0 %v2072_v1 }
 0x4c2   : > { %1694 = vmatmul.mubr.msk.f32.vlgmr.msra.gmra.mrb[6].mxu0 %vm437_vm1, %v925_v5 }
 0x4c3   : > { %1709 = vmatprep.mubr.msk.f32.mxu0 %vm2073_vm0, %v2071_v0  ;;  %1803 = vmatpush3.bf16.msra.mxu0 %v1802_v28 }
 0x4c4   : > { %1804 = vmatprep.subr.bf16.mxu0 %v2072_v1 }
 0x4c7   : > { %1806 = vmatpush3.bf16.msra.mxu0 %v1805_v30 }
 0x4c8   : > { %1807 = vmatprep.subr.bf16.mxu0 %v2072_v1 }
 0x51d   : > { %v920_v6 = vpop.f32.mrb[8].mxu1 }
 0x51e   : > { %v1690_v7 = vpop.f32.mrb[9].mxu1 }
 0x591   : > { %v847_v8 = vpop.f32.mrb[4].mxu0 }
 0x592   : > { %v2370_v9 = vadd.f32 %v920_v6, %v847_v8  ;;  %v1679_v10 = vpop.f32.mrb[5].mxu0 }
 0x595   : > { %v998_v11 = vpop.f32.mrb[6].mxu0 }
 0x596   : > { %v1002_v12 = vmul.f32 0.10910895, %v998_v11  ;;  %v1695_v14 = vpop.f32.mrb[7].mxu0 }
 0x598   : > { %v1003_v16 = vsel %vm436_vm2, %v1002_v12, -1e+30 }
 0x599   : > { %v1004_v17 = vsel %vm516_vm3, %v1003_v16, -inf }
 0x59a   : > { %1005 = vmax.xlane.f32.xlu1 %v1004_v17 }
 0x627   : > { %v1006_v18 = vpop.xlane.xlu1 %1005 }
 0x628   : > { %v1007_v19 = vsub.f32 %v1003_v16, %v1006_v18 }
 0x62a   : > { %v1008_v22 = vmul.f32 1.442695, %v1007_v19 }
 0x62c   : > { %1898 = vpow2.f32 %v1008_v22 }
 0x636   : > { %v1899_v23 = vpop.eup %1898 }
 0x637   : > { %v1010_v24 = vsel %vm516_vm3, %v1899_v23, 0.0 }
 0x638   : > { %1011 = vadd.xlane.f32.xlu0 %v1010_v24 }
 0x64e   : > { %1170 = vrot.lane.b32.xlu0 %v2306_v13, %s2076_s30 }
 0x6c5   : > { %v1012_v32 = vpop.xlane.xlu0 %1011 }
 0x6c6   : > { %1900 = vrcp.f32 %v1012_v32 }
 0x6c9   : > { %v1171_v13 = vpop.permute.xlu0 %1170 }
 0x6d0   : > { %v1901_v33 = vpop.eup %1900 }
 0x6d1   : > { %v1014_v34 = vmul.f32 %v1901_v33, %v1899_v23 }
 0x6d3   : > { %1699 = vmatmul.mubr.msk.f32.vlgmr.msra.gmra.mrb[10].mxu1 %vm516_vm3, %v1014_v34 }
 0x6d4   : > { %1713 = vmatpush3.xpose.msk.msra.mxu1 %vm437_vm1, %v1173_v31  ;;  %1714 = vmatprep.mubr.msk.f32.mxu1 %vm2073_vm0, %v2071_v0 }
 0x6d5   : > { %1717 = vmatprep.subr.mxu1 %v2071_v0 }
 0x6d7   : > { %1715 = vmatmul.mubr.msk.f32.vlgmr.msra.gmra.mrb[12].mxu1 %vm437_vm1, %v1171_v13 }
 0x6d8   : > { %1719 = vmatprep.mubr.msk.f32.mxu1 %vm2073_vm0, %v2071_v0 }
 0x7a6   : > { %v1087_v35 = vpop.f32.mrb[10].mxu1 }
 0x7a7   : > { %v1700_v36 = vpop.f32.mrb[11].mxu1  ;;  %1710 = vmatmul.mubr.msk.f32.vlgmr.msra.gmra.mrb[8].mxu0 %vm437_vm1, %v1087_v35 }
 0x7a8   : > { %1730 = vmatprep.mubr.msk.f32.mxu0 %vm2073_vm0, %v2071_v0  ;;  %v1338_v0 = vld [vmem:[#allocation7 + $0x60] sm:$0xff] }
 0x7a9   : > { %v1808_v49 = vpack.c.bf16 %v1339_v47, %v1338_v0 }
 0x7aa   : > { %v1244_v37 = vpop.f32.mrb[12].mxu1 }
 0x7ab   : > { %v1248_v38 = vmul.f32 0.10910895, %v1244_v37  ;;  %v1716_v39 = vpop.f32.mrb[13].mxu1  ;;  %1809 = vmatpush3.bf16.msra.mxu0 %v1808_v49 }
 0x7ac   : > { %1810 = vmatprep.subr.bf16.mxu0 %v2072_v1 }
 0x7ad   : > { %v1249_v40 = vsel %vm436_vm2, %v1248_v38, -1e+30 }
 0x7ae   : > { %v1250_v41 = vsel %vm516_vm3, %v1249_v40, -inf }
 0x7af   : > { %1251 = vmax.xlane.f32.xlu0 %v1250_v41  ;;  %1812 = vmatpush3.bf16.msra.mxu0 %v1811_v21 }
 0x83c   : > { %v1252_v42 = vpop.xlane.xlu0 %1251 }
 0x83d   : > { %v1253_v43 = vsub.f32 %v1249_v40, %v1252_v42 }
 0x83f   : > { %v1254_v44 = vmul.f32 1.442695, %v1253_v43 }
 0x841   : > { %1902 = vpow2.f32 %v1254_v44 }
 0x84b   : > { %v1903_v45 = vpop.eup %1902 }
 0x84c   : > { %v1256_v46 = vsel %vm516_vm3, %v1903_v45, 0.0 }
 0x84d   : > { %1257 = vadd.xlane.f32.xlu1 %v1256_v46 }
 0x85e   : > { %1261 = vrot.lane.b32.xlu1 %v2317_v15, %s2076_s30 }
 0x87a   : > { %v1165_v50 = vpop.f32.mrb[8].mxu0 }
 0x87b   : > { %v1169_v51 = vadd.f32 %v1165_v50, %v2370_v9  ;;  %v1711_v52 = vpop.f32.mrb[9].mxu0 }
 0x8da   : > { %v1258_v53 = vpop.xlane.xlu1 %1257 }
 0x8db   : > { %1904 = vrcp.f32 %v1258_v53 }
 0x8de   : > { %v1262_v54 = vpop.permute.xlu1 %1261 }
 0x8df   : > { %1718 = vmatpush3.msra.mxu1 %v1262_v54 }
 0x8e5   : > { %v1905_v15 = vpop.eup %1904 }
 0x8e6   : > { %v1260_v55 = vmul.f32 %v1905_v15, %v1903_v45 }
 0x8e8   : > { %1720 = vmatmul.mubr.msk.f32.vlgmr.msra.gmra.mrb[14].mxu1 %vm516_vm3, %v1260_v55 }
 0x9bb   : > { %v1333_v56 = vpop.f32.mrb[14].mxu1 }
 0x9bc   : > { %v1721_v57 = vpop.f32.mrb[15].mxu1  ;;  %1731 = vmatmul.mubr.msk.f32.vlgmr.msra.gmra.mrb[10].mxu0 %vm437_vm1, %v1333_v56 }
 0xa8f   : > { %v1411_v1 = vpop.f32.mrb[10].mxu0 }
 0xa90   : > { %v1415_v59 = vadd.f32 %v1411_v1, %v1169_v51  ;;  %v1732_v60 = vpop.f32.mrb[11].mxu0 }
 0xa92   : > { %v1423_v61 = vadd.f32 %v1556_v58, %v1415_v59 }
 0xa94   : > { %1424 = vst [vmem:[%s241_s12] sm:$0xff] %v1423_v61 }
 0xa95   : > { %2005 = shalt.err (!%p2002_p2)
}
 0xa96   : > { %s2006_s5 = scalar_lea.hbm %s2412_s28, 128  ;;  %s2010_s23 = scalar_lea.hbm %s2460_s4, 256 }
 0xa97   : > { %p2007_p13 = scmp.ne.s32.totalorder %s2412_s28, %s2006_s5  ;;  %p2011_p4 = scmp.lt.u32.totalorder %s2412_s28, %s2460_s4 }
 0xa98   : > { %p2012_p7 = scmp.lt.u32.totalorder %s2010_s23, %s2006_s5  ;;  %p2014_p11 = scmp.lt.u32.totalorder %s2006_s5, %s2412_s28 }
 0xa99   : > { %p2008_p6 = pnand %p2007_p13, %p2474_p0 }
 0xa9a   : > { %p2013_p8 = por %p2012_p7, %p2011_p4 }
 0xa9b   : > { %p2009_p10 = pneg %p2008_p6 }
 0xa9c   : > { %p2015_p1 = por %p2014_p11, %p2013_p8 }
 0xa9e   : > { %p2016_p3 = pnand %p2015_p1, %p2009_p10 }
 0xaa0   : > { %2019 = shalt.err (!%p2016_p3)
}
 0xaa1   : > { %1823 = dma.vmem_to_hbm [thread:$0]  (%p2474_p0), %s2414_s13, 128, %s2412_s28, %s1426_s27  }
 0xaa2 PF: > { %s1451_s25 = sand.u32 1, %s2050_s15   ;;  %p2475_p5 = scmp.ne.s32.totalorder %s2465_s22, 0 }
 0xaa3   : > { %p2476_p9 = scmp.ge.s32.totalorder %s2062_s18, 2  ;;  %s1452_s7 = scalar_lea.sflag [#allocation4], %s1451_s25 }
 0xaa5   : > { %p1837_p12 = pnand %p2476_p9, %p2475_p5 }
 0xaa7   : > { %2045 = dma.done.wait (!%p1837_p12), %s1452_s7, 128  }
 0xaa8   : > { %2047 = vsyncadd (!%p1837_p12), %s1452_s7, 4294967168  ;;  %p18_p2 = scmp.ge.s32.totalorder %s2213_s11, 4   ;;  %s2477_s15 = smov %s2054_s16 }
 0xaa9   : > { %s2478_s16 = smov %s2058_s17  ;;  %s2479_s17 = smov %s2222_s14 }
 0xaaa   : > { %s2480_s18 = smov %s2213_s11  ;;  %20 = sbr.rel (!%p18_p2) target bundleno = 6 (0x6), region = 92 }
 0xab1   :  { %1457 = vsyncpa [#allocation3], 1 }
 0xab2   :  { %1459 = vsyncpa [#allocation3 + $0x1], 1 }
 0xab3   :  { %1460 = vsyncpa [#allocation6], 1 }
 0xab4   :  { %1461 = vsyncpa [#allocation4], 1 }
 0xab5   :  { %1463 = vsyncpa [#allocation4 + $0x1], 1 }

</bundles_post_ra>
